<compile_context>
chip_gen: v7x
topology: tpu7x:2x2x1
jax: 0.10.0
libtpu: 0.0.40
codegen_flags: <defaults>
</compile_context>

<pallas_src>
import functools

import jax
import jax.numpy as jnp
from jax.experimental import pallas as pl
from jax.experimental.pallas import tpu as pltpu


def _gated_attention_kernel(x_ref, w_ref, b_ref, w2_ref, b2_ref, o_ref,
                            *, hidden, out_features, bag):
    # x_ref  : (N_pad, D)  bf16  -- one batch's bag tile (bag padded to 128s)
    # w_ref  : (2H, D)     bf16  -- stacked [Wv; Wu] (pinned, constant index_map)
    # b_ref  : (2H, 1)     f32   -- stacked [bv; bu]
    # w2_ref : (H, O)      f32   -- attention Linear weight, transposed
    # b2_ref : (O, 1)      f32
    # o_ref  : (O, N_pad)  x.dtype -- per-batch softmax weights, bag dim on lanes
    n_pad = x_ref.shape[0]

    # One fused MXU pass, contracting D on both operands: (2H, N_pad), f32 acc.
    dn = (((1,), (1,)), ((), ()))
    hg = jax.lax.dot_general(w_ref[...], x_ref[...], dn,
                             preferred_element_type=jnp.float32) + b_ref[...]

    h = jnp.tanh(hg[:hidden, :])            # (H, N_pad) f32
    g = jax.nn.sigmoid(hg[hidden:, :])      # (H, N_pad) f32
    a = h * g                               # (H, N_pad) f32

    # H -> O projection. For tiny O keep it off the MXU (VPU mul + XLU sublane
    # reduce); for larger O a small MXU matmul is cheaper.
    if out_features <= 4:
        cols = [jnp.sum(a * w2_ref[:, o:o + 1], axis=0, keepdims=True)
                for o in range(out_features)]
        logits = cols[0] if out_features == 1 else jnp.concatenate(cols, axis=0)
    else:
        logits = jax.lax.dot_general(w2_ref[...], a, (((0,), (0,)), ((), ())),
                                     preferred_element_type=jnp.float32)
    logits = logits + b2_ref[...]           # (O, N_pad)

    # Mask padded bag columns so the per-batch softmax ignores them.
    if bag != n_pad:
        lane = jax.lax.broadcasted_iota(jnp.int32, logits.shape, 1)
        logits = jnp.where(lane < bag, logits, -jnp.inf)

    m = jnp.max(logits, axis=1, keepdims=True)
    e = jnp.exp(logits - m)
    s = jnp.sum(e, axis=1, keepdims=True)
    inv = pl.reciprocal(s, approx=True)     # EUP vrcp (idle slot)
    inv = inv * (2.0 - s * inv)             # one Newton step -> full f32 accuracy
    o_ref[...] = (e * inv).astype(o_ref.dtype)


def gated_attention_forward(x, wv, bv, wu, bu, w2, b2):
    """GatedAttention forward.

    x : (B, N, D)  features (batch, bag, in_features)
    wv, bv : (H, D), (H,)   attention_hidden Linear (PyTorch layout)
    wu, bu : (H, D), (H,)   gate Linear
    w2, b2 : (O, H), (O,)   attention Linear
    returns attention weights of shape (B, N, O), softmaxed over the bag dim.
    """
    B, N, D = x.shape
    H = wv.shape[0]
    O = w2.shape[0]

    LANE = 128
    n_pad = ((N + LANE - 1) // LANE) * LANE

    x_p = x if n_pad == N else jnp.pad(x, ((0, 0), (0, n_pad - N), (0, 0)))
    x_bf = x_p.astype(jnp.bfloat16)                               # MXU-native dtype

    # Wrapper-side (tiny) layout plumbing: stack the two projections, keep
    # biases / second layer in f32.
    w_st = jnp.concatenate([wv, wu], axis=0).astype(jnp.bfloat16)          # (2H, D)
    b_st = jnp.concatenate([bv, bu], axis=0).reshape(2 * H, 1).astype(jnp.float32)
    w2t = jnp.transpose(w2).astype(jnp.float32)                            # (H, O)
    b2c = b2.reshape(O, 1).astype(jnp.float32)

    kernel = functools.partial(_gated_attention_kernel,
                               hidden=H, out_features=O, bag=N)

    out = pl.pallas_call(
        kernel,
        grid=(B,),
        out_shape=jax.ShapeDtypeStruct((B, O, n_pad), x.dtype),
        in_specs=[
            # per-batch x tile, double-buffered by the pipeline
            pl.BlockSpec((None, n_pad, D), lambda b: (b, 0, 0)),
            # weights/biases pinned in VMEM (constant block index -> no re-DMA)
            pl.BlockSpec((2 * H, D), lambda b: (0, 0)),
            pl.BlockSpec((2 * H, 1), lambda b: (0, 0)),
            pl.BlockSpec((H, O), lambda b: (0, 0)),
            pl.BlockSpec((O, 1), lambda b: (0, 0)),
        ],
        out_specs=pl.BlockSpec((None, O, n_pad), lambda b: (b, 0, 0)),
        compiler_params=pltpu.CompilerParams(
            dimension_semantics=("parallel",),        # 2x on v7x's two TCs
            vmem_limit_bytes=32 * 1024 * 1024),       # raises v5e's 16 MiB default
    )(x_bf, w_st, b_st, w2t, b2c)

    # (B, O, N_pad) -> crop bag padding -> (B, N, O)
    return jnp.transpose(out[:, :, :N], (0, 2, 1))


def _reference(x, wv, bv, wu, bu, w2, b2):
    h = jnp.tanh(jnp.einsum("bnd,hd->bnh", x, wv) + bv)
    g = jax.nn.sigmoid(jnp.einsum("bnd,hd->bnh", x, wu) + bu)
    a = h * g
    logits = jnp.einsum("bnh,oh->bno", a, w2) + b2
    return jax.nn.softmax(logits, axis=1)


if __name__ == "__main__":
    # Small shapes consistent with (batch, bag, in_features) input.
    B, N, D, H, O = 2, 8, 32, 16, 1

    key = jax.random.PRNGKey(0)
    kx, kwv, kbv, kwu, kbu, kw2, kb2 = jax.random.split(key, 7)

    x = jax.random.normal(kx, (B, N, D), dtype=jnp.float32)

    # Parameters in PyTorch nn.Linear layout: weight (out, in), bias (out,).
    wv = jax.random.normal(kwv, (H, D), dtype=jnp.float32) * (1.0 / jnp.sqrt(D))
    bv = jax.random.normal(kbv, (H,), dtype=jnp.float32) * 0.01
    wu = jax.random.normal(kwu, (H, D), dtype=jnp.float32) * (1.0 / jnp.sqrt(D))
    bu = jax.random.normal(kbu, (H,), dtype=jnp.float32) * 0.01
    w2 = jax.random.normal(kw2, (O, H), dtype=jnp.float32) * (1.0 / jnp.sqrt(H))
    b2 = jax.random.normal(kb2, (O,), dtype=jnp.float32) * 0.01

    out = gated_attention_forward(x, wv, bv, wu, bu, w2, b2)
    out = jax.block_until_ready(out)
    assert out.shape == (B, N, O)

    # Tight check against a reference that applies the same bf16 rounding the
    # kernel's MXU operands see (products are exact in f32, so this matches
    # to f32 rounding).
    xr = x.astype(jnp.bfloat16).astype(jnp.float32)
    wvr = wv.astype(jnp.bfloat16).astype(jnp.float32)
    wur = wu.astype(jnp.bfloat16).astype(jnp.float32)
    ref_bf = _reference(xr, wvr, bv, wur, bu, w2, b2)
    assert jnp.allclose(out, ref_bf, atol=2e-4, rtol=2e-4), \
        "mismatch vs bf16-rounded reference"

    # Loose check against the pure-f32 module semantics (bf16 MXU inputs).
    ref_f32 = _reference(x, wv, bv, wu, bu, w2, b2)
    assert jnp.allclose(out, ref_f32, atol=3e-2), "mismatch vs f32 reference"

    # Attention weights sum to 1 over the bag dimension.
    assert jnp.allclose(jnp.sum(out, axis=1), 1.0, atol=1e-5)

    print("KERNEL_OK")
</pallas_src>

<mosaic_0001>
module attributes {stable_mosaic.version = 11 : i64} {
  func.func @_gated_attention_kernel(%arg0: i32, %arg1: memref<1x128x32xbf16, #tpu.memory_space<vmem>>, %arg2: memref<32x32xbf16, #tpu.memory_space<vmem>>, %arg3: memref<32x1xf32, #tpu.memory_space<vmem>>, %arg4: memref<16x1xf32, #tpu.memory_space<vmem>>, %arg5: memref<1x1xf32, #tpu.memory_space<vmem>>, %arg6: memref<1x1x128xf32, #tpu.memory_space<vmem>>) attributes {dimension_semantics = [#tpu.dimension_semantics<parallel>], iteration_bounds = array<i64: 2>, scalar_prefetch = 0 : i64, scratch_operands = 0 : i64, tpu.core_type = #tpu.core_type<tc>, window_params = [{transform_indices = @transform_0, window_bounds = array<i64: 1, 128, 32>}, {pipeline_mode = #tpu.pipeline_mode<synchronous>, transform_indices = @transform_1, window_bounds = array<i64: 32, 32>}, {pipeline_mode = #tpu.pipeline_mode<synchronous>, transform_indices = @transform_2, window_bounds = array<i64: 32, 1>}, {pipeline_mode = #tpu.pipeline_mode<synchronous>, transform_indices = @transform_3, window_bounds = array<i64: 16, 1>}, {pipeline_mode = #tpu.pipeline_mode<synchronous>, transform_indices = @transform_4, window_bounds = array<i64: 1, 1>}, {transform_indices = @transform_5, window_bounds = array<i64: 1, 1, 128>}]} {
    %c0 = arith.constant 0 : index
    %c0_0 = arith.constant 0 : index
    %0 = vector.load %arg2[%c0, %c0_0] : memref<32x32xbf16, #tpu.memory_space<vmem>>, vector<32x32xbf16>
    %c0_1 = arith.constant 0 : index
    %c0_2 = arith.constant 0 : index
    %c0_3 = arith.constant 0 : index
    %1 = vector.load %arg1[%c0_1, %c0_2, %c0_3] : memref<1x128x32xbf16, #tpu.memory_space<vmem>>, vector<1x128x32xbf16>
    %2 = vector.shape_cast %1 : vector<1x128x32xbf16> to vector<128x32xbf16>
    %cst = arith.constant dense<0.000000e+00> : vector<32x128xf32>
    %3 = tpu.matmul %0, %2, %cst {dimension_numbers = #tpu.dot_dimension_numbers<[1], [1], [0], [0], [0, 0, 1, 0], [], []>} : vector<32x32xbf16>, vector<128x32xbf16>, vector<32x128xf32> -> vector<32x128xf32>
    %c0_4 = arith.constant 0 : index
    %c0_5 = arith.constant 0 : index
    %4 = vector.load %arg3[%c0_4, %c0_5] : memref<32x1xf32, #tpu.memory_space<vmem>>, vector<32x1xf32>
    %5 = vector.broadcast %4 : vector<32x1xf32> to vector<32x128xf32>
    %6 = arith.addf %3, %5 : vector<32x128xf32>
    %7 = vector.extract_strided_slice %6 {offsets = [0, 0], sizes = [16, 128], strides = [1, 1]} : vector<32x128xf32> to vector<16x128xf32>
    %8 = math.tanh %7 : vector<16x128xf32>
    %9 = vector.extract_strided_slice %6 {offsets = [16, 0], sizes = [16, 128], strides = [1, 1]} : vector<32x128xf32> to vector<16x128xf32>
    %10 = arith.negf %9 : vector<16x128xf32>
    %11 = math.exp %10 : vector<16x128xf32>
    %cst_6 = arith.constant 1.000000e+00 : f32
    %12 = vector.broadcast %cst_6 : f32 to vector<16x128xf32>
    %13 = arith.addf %12, %11 : vector<16x128xf32>
    %14 = arith.divf %12, %13 : vector<16x128xf32>
    %15 = arith.mulf %8, %14 : vector<16x128xf32>
    %c0_7 = arith.constant 0 : index
    %c0_8 = arith.constant 0 : index
    %16 = vector.load %arg4[%c0_7, %c0_8] : memref<16x1xf32, #tpu.memory_space<vmem>>, vector<16x1xf32>
    %17 = vector.broadcast %16 : vector<16x1xf32> to vector<16x128xf32>
    %18 = arith.mulf %15, %17 : vector<16x128xf32>
    %cst_9 = arith.constant dense<0.000000e+00> : vector<128xf32>
    %19 = vector.multi_reduction <add>, %18, %cst_9 [0] : vector<16x128xf32> to vector<128xf32>
    %20 = vector.shape_cast %19 : vector<128xf32> to vector<1x128xf32>
    %c0_10 = arith.constant 0 : index
    %c0_11 = arith.constant 0 : index
    %21 = vector.load %arg5[%c0_10, %c0_11] : memref<1x1xf32, #tpu.memory_space<vmem>>, vector<1x1xf32>
    %22 = vector.broadcast %21 : vector<1x1xf32> to vector<1x128xf32>
    %23 = arith.addf %20, %22 : vector<1x128xf32>
    %24 = tpu.iota {dimensions = array<i32: 1>} : vector<1x128xi32>
    %c8_i32 = arith.constant 8 : i32
    %25 = vector.broadcast %c8_i32 : i32 to vector<1x128xi32>
    %26 = arith.cmpi slt, %24, %25 : vector<1x128xi32>
    %cst_12 = arith.constant 0xFF800000 : f32
    %27 = vector.broadcast %cst_12 : f32 to vector<1x128xf32>
    %28 = arith.select %26, %23, %27 : vector<1x128xi1>, vector<1x128xf32>
    %cst_13 = arith.constant dense<0xFF800000> : vector<1xf32>
    %29 = vector.multi_reduction <maximumf>, %28, %cst_13 [1] : vector<1x128xf32> to vector<1xf32>
    %30 = vector.shape_cast %29 : vector<1xf32> to vector<1x1xf32>
    %31 = vector.broadcast %30 : vector<1x1xf32> to vector<1x128xf32>
    %32 = arith.subf %28, %31 : vector<1x128xf32>
    %33 = math.exp %32 : vector<1x128xf32>
    %cst_14 = arith.constant dense<0.000000e+00> : vector<1xf32>
    %34 = vector.multi_reduction <add>, %33, %cst_14 [1] : vector<1x128xf32> to vector<1xf32>
    %35 = vector.shape_cast %34 : vector<1xf32> to vector<1x1xf32>
    %36 = tpu.reciprocal %35 {approx = true} : vector<1x1xf32> -> vector<1x1xf32>
    %37 = arith.mulf %35, %36 : vector<1x1xf32>
    %cst_15 = arith.constant 2.000000e+00 : f32
    %38 = vector.broadcast %cst_15 : f32 to vector<1x1xf32>
    %39 = arith.subf %38, %37 : vector<1x1xf32>
    %40 = arith.mulf %36, %39 : vector<1x1xf32>
    %41 = vector.broadcast %40 : vector<1x1xf32> to vector<1x128xf32>
    %42 = arith.mulf %33, %41 : vector<1x128xf32>
    %c0_16 = arith.constant 0 : index
    %c0_17 = arith.constant 0 : index
    %c0_18 = arith.constant 0 : index
    %43 = vector.load %arg6[%c0_16, %c0_17, %c0_18] : memref<1x1x128xf32, #tpu.memory_space<vmem>>, vector<1x1x128xf32>
    %44 = vector.shape_cast %43 : vector<1x1x128xf32> to vector<1x128xf32>
    %45 = vector.shape_cast %42 : vector<1x128xf32> to vector<1x1x128xf32>
    tpu.vector_store %arg6[%c0_16, %c0_17, %c0_18], %45 {strides = array<i32>} : memref<1x1x128xf32, #tpu.memory_space<vmem>>, vector<1x1x128xf32>,
    return
  }
  func.func @transform_0(%arg0: i32) -> (i32, i32, i32) {
    %c0_i32 = arith.constant 0 : i32
    %c0_i32_0 = arith.constant 0 : i32
    %c0_i32_1 = arith.constant 0 : i32
    return %arg0, %c0_i32, %c0_i32_0 : i32, i32, i32
  }
  func.func @transform_1(%arg0: i32) -> (i32, i32) {
    %c0_i32 = arith.constant 0 : i32
    %c0_i32_0 = arith.constant 0 : i32
    %c0_i32_1 = arith.constant 0 : i32
    return %c0_i32, %c0_i32_0 : i32, i32
  }
  func.func @transform_2(%arg0: i32) -> (i32, i32) {
    %c0_i32 = arith.constant 0 : i32
    %c0_i32_0 = arith.constant 0 : i32
    %c0_i32_1 = arith.constant 0 : i32
    return %c0_i32, %c0_i32_0 : i32, i32
  }
  func.func @transform_3(%arg0: i32) -> (i32, i32) {
    %c0_i32 = arith.constant 0 : i32
    %c0_i32_0 = arith.constant 0 : i32
    %c0_i32_1 = arith.constant 0 : i32
    return %c0_i32, %c0_i32_0 : i32, i32
  }
  func.func @transform_4(%arg0: i32) -> (i32, i32) {
    %c0_i32 = arith.constant 0 : i32
    %c0_i32_0 = arith.constant 0 : i32
    %c0_i32_1 = arith.constant 0 : i32
    return %c0_i32, %c0_i32_0 : i32, i32
  }
  func.func @transform_5(%arg0: i32) -> (i32, i32, i32) {
    %c0_i32 = arith.constant 0 : i32
    %c0_i32_0 = arith.constant 0 : i32
    %c0_i32_1 = arith.constant 0 : i32
    return %arg0, %c0_i32, %c0_i32_0 : i32, i32, i32
  }
}

</mosaic_0001>

<bundles_post_ra>
// kernel: tpu_custom_call.1
= control target key start
LH: loop header
LB: loop body
LE: loop exit
PB: predicated region body
PF: predicated region fallthrough
CT: control target
= control target key end

     0   :  { %s913_s0 = inlined_call_operand.vmem [shape: bf16[2,128,32], index: 0, kind: input, shape index: {}]   ;;  %s914_s1 = inlined_call_operand.vmem [shape: bf16[32,32], index: 1, kind: input, shape index: {}]   ;;  %s915_s2 = inlined_call_operand.vmem [shape: f32[32,1], index: 2, kind: input, shape index: {}]   ;;  %s916_s3 = inlined_call_operand.vmem [shape: f32[16,1], index: 3, kind: input, shape index: {}]   ;;  %s917_s4 = inlined_call_operand.<no memory space> [shape: f32[1,1], index: 4, kind: input, shape index: {}]   ;;  %s918_s5 = inlined_call_operand.hbm [shape: f32[2,1,128], index: 5, kind: output, shape index: {}]  }
   0x1   :  { %v10_v0 = vstv %s917_s4 }
   0x2   :  { %11 = vst [vmem:[#allocation2] sm:$0x1] %v10_v0 }
   0x3   :  { %12 = vsyncpa [#allocation4], 0 }
   0x4   :  { %14 = vsyncpa [#allocation4 + $0x1], 0  ;;  %s761_s20 = smov 0   ;;  %s763_s21 = smov 0  }
   0x5   :  { %s765_s22 = smov 0   ;;  %s767_s23 = smov 0  }
   0x6 LB: > { %s782_s4 = sadd.s32 4294967295, %s724_s23   ;;  %s532_s24 = sadd.s32 4294967294, %s724_s23   ;;  %s724_s23 = sphi %s767_s23, %s924_s23   ;;  %s720_s22 = sphi %s765_s22, %s923_s22   ;;  %s716_s21 = sphi %s763_s21, %s922_s21   ;;  %s712_s20 = sphi %s761_s20, %s921_s20  }
   0x7   : > { %s786_s25 = sadd.s32 1, %s724_s23   ;;  %s137_s26 = sadd.s32 1, %s720_s22 }
   0x8   : > { %s134_s27 = ssub.s32 %s724_s23, %s786_s25  ;;  %p147_p0 = scmp.ne.s32.totalorder %s720_s22, %s716_s21 }
   0x9   : > { %p135_p1 = scmp.eq.s32.totalorder %s134_s27, 0  ;;  %p148_p2 = scmp.eq.s32.totalorder %s782_s4, 1 }
   0xa   : > { %p153_p3 = scmp.ne.s32.totalorder %s716_s21, %s712_s20  ;;  %p154_p4 = scmp.eq.s32.totalorder %s532_s24, 1 }
   0xb   : > { %s797_s28 = scalar_select %p135_p1, %s720_s22, %s137_s26  }
   0xc   : > { %p799_p5 = por %p148_p2, %p147_p0  ;;  %p803_p6 = por %p154_p4, %p153_p3 }
   0xd   : > { %p535_p7 = scmp.ge.s32.totalorder %s724_s23, 1  ;;  %p192_p8 = scmp.lt.s32.totalorder %s724_s23, 3 }
   0xf   : > { %p193_p9 = pnand %p535_p7, %p192_p8 }
  0x10   : > { %p219_p10 = scmp.lt.s32.totalorder (!%p193_p9), %s782_s4, 1  ;;  %v644_v1 = vld [vmem:[%s914_s1] sm:$0xff] (!%p193_p9)   ;;  %vm319_vm0 = vcmask (!%p193_p9), 261120   ;;  %v726_v2 = vmov (!%p193_p9), 0   ;;  %v247_v3 = vld [vmem:[%s915_s2 + $0x10] sm:$0xff] (!%p193_p9)  ;;  %v248_v5 = vld [vmem:[%s915_s2 + $0x18] sm:$0xff] (!%p193_p9)  ;;  %v442_v55 = vlaneseq (!%p193_p9) }
  0x11   : > { %196 = sbr.rel (%p193_p9) target bundleno = 688 (0x2b0), region = 40  ;;  %634 = vset.pattern.permute.xlu0 (!%p193_p9), %v726_v2  ;;  %635 = vset.pattern.permute.xlu1 (!%p193_p9), %v726_v2  ;;  %v245_v4 = vld [vmem:[%s915_s2] sm:$0xff] (!%p193_p9)  ;;  %v246_v6 = vld [vmem:[%s915_s2 + $0x8] sm:$0xff] (!%p193_p9)  ;;  %s217_s10 = sand.u32 (!%p193_p9), 1, %s716_s21  }
  0x12   : > { %582 = vmatprep.mubr.msk.bf16.mxu0 (!%p193_p9), %vm319_vm0, %v644_v1  ;;  %261 = vperm.xlu0 (!%p193_p9), %634, %v247_v3   ;;  %v415_v10 = vld [vmem:[%s916_s3] sm:$0xff] (!%p193_p9)  ;;  %v416_v11 = vld [vmem:[%s916_s3 + $0x8] sm:$0xff] (!%p193_p9)  ;;  %v443_v58 = vshrl.u32 (!%p193_p9), %v442_v55, 7  ;;  %v448_v0 = vand.u32 (!%p193_p9), 127, %v442_v55  ;;  %s552_s11 = sshll.u32 (!%p193_p9), %s782_s4, 4  ;;  %s218_s12 = scalar_lea.vmem (!%p193_p9), [#allocation3], %s217_s10 }
  0x13   : > { %251 = vperm.xlu1 (!%p193_p9), %635, %v245_v4   ;;  %v436_v12 = vld [vmem:[#allocation2] sm:$0x1] (!%p193_p9)  ;;  %v645_v26 = vld [vmem:[%s914_s1 + $0x8] sm:$0xff] (!%p193_p9)   ;;  %s871_s16 = scalar_lea.hbm (!%p193_p9), %s918_s5, %s552_s11  ;;  %s465_s17 = scalar_lea.sflag (!%p193_p9), [#allocation4], %s217_s10 }
  0x14   : > { %v444_v61 = vsub.s32 (!%p193_p9), 0, %v443_v58  ;;  %vm449_vm1 = vcmp.lt.s32.totalorder (!%p193_p9), %v448_v0, 8 }
  0x16   : > { %266 = vperm.xlu0 (!%p193_p9), %634, %v248_v5  }
  0x17   : > { %256 = vperm.xlu1 (!%p193_p9), %635, %v246_v6  }
  0x18   : > { %s220_s8 = scalar_select %p219_p10, %s782_s4, 1 }
  0x19   : > { %s727_s4 = smov [#allocation3]  }
  0x1a   : > { %s555_s13 = sshll.u32 %s220_s8, 6  ;;  %419 = vperm.xlu0 %634, %v415_v10   ;;  %s666_s19 = sshll.u32 %s727_s4, 4  ;;  %s667_s19 = int_to_ptr.vmem [resolvable:$false] %s666_s19 }
  0x1b   : > { %s827_s18 = scalar_lea.vmem %s913_s0, %s555_s13  ;;  %424 = vperm.xlu1 %635, %v416_v11   ;;  %s477_s13 = sshll.u32 %s218_s12, 4  ;;  %s873_s13 = int_to_ptr.vmem [resolvable:$true] %s477_s13 }
  0x1c   : > { %v636_v7 = vld [vmem:[%s827_s18] sm:$0xff]   ;;  %v637_v8 = vld [vmem:[%s827_s18 + $0x8] sm:$0xff]   ;;  %v638_v14 = vld [vmem:[%s827_s18 + $0x10] sm:$0xff]   ;;  %s668_s24 = scalar_lea.vmem %s667_s19, 32  ;;  %p669_p0 = scmp.lt.s32.totalorder %s873_s13, %s667_s19 }
  0x1d   : > { %586 = vmatprep.subr.msk.bf16.mxu0 %vm319_vm0, %v636_v7  ;;  %v327_v9 = vsel %vm319_vm0, %v636_v7, 0  ;;  %v330_v13 = vsel %vm319_vm0, %v637_v8, 0  ;;  %v333_v15 = vsel %vm319_vm0, %v638_v14, 0  ;;  %v639_v16 = vld [vmem:[%s827_s18 + $0x18] sm:$0xff]   ;;  %v640_v18 = vld [vmem:[%s827_s18 + $0x20] sm:$0xff]   ;;  %v641_v20 = vld [vmem:[%s827_s18 + $0x28] sm:$0xff]  }
  0x1e   : > { %567 = vmatpush3.bf16.xpose.msra.mxu0 %v327_v9  ;;  %439 = vperm.xlu0 %634, %v436_v12   ;;  %v336_v17 = vsel %vm319_vm0, %v639_v16, 0  ;;  %v339_v19 = vsel %vm319_vm0, %v640_v18, 0  ;;  %v342_v21 = vsel %vm319_vm0, %v641_v20, 0  ;;  %v642_v22 = vld [vmem:[%s827_s18 + $0x30] sm:$0xff]   ;;  %v643_v24 = vld [vmem:[%s827_s18 + $0x38] sm:$0xff]   ;;  %s662_s18 = scalar_lea.vmem %s873_s13, 16 }
  0x1f   : > { %587 = vmatprep.subr.msk.bf16.mxu0 %vm319_vm0, %v637_v8  ;;  %v345_v23 = vsel %vm319_vm0, %v642_v22, 0  ;;  %v348_v25 = vsel %vm319_vm0, %v643_v24, 0  ;;  %p663_p11 = scmp.ne.s32.totalorder %s873_s13, %s662_s18  ;;  %p670_p1 = scmp.lt.s32.totalorder %s668_s24, %s662_s18 }
  0x21   : > { %p664_p12 = pnand %p663_p11, %p799_p5  ;;  %p671_p2 = por %p670_p1, %p669_p0 }
  0x23   : > { %p665_p13 = pneg %p664_p12 }
  0x25   : > { %p672_p3 = pnand %p671_p2, %p665_p13 }
  0x26   : > { %569 = vmatpush3.bf16.xpose.msra.mxu0 %v330_v13 }
  0x27   : > { %588 = vmatprep.subr.msk.bf16.mxu0 %vm319_vm0, %v638_v14 }
  0x2e   : > { %571 = vmatpush3.bf16.xpose.msra.mxu0 %v333_v15 }
  0x2f   : > { %589 = vmatprep.subr.msk.bf16.mxu0 %vm319_vm0, %v639_v16 }
  0x36   : > { %573 = vmatpush3.bf16.xpose.msra.mxu0 %v336_v17 }
  0x37   : > { %590 = vmatprep.subr.msk.bf16.mxu0 %vm319_vm0, %v640_v18 }
  0x3e   : > { %575 = vmatpush3.bf16.xpose.msra.mxu0 %v339_v19 }
  0x3f   : > { %591 = vmatprep.subr.msk.bf16.mxu0 %vm319_vm0, %v641_v20 }
  0x46   : > { %577 = vmatpush3.bf16.xpose.msra.mxu0 %v342_v21 }
  0x47   : > { %592 = vmatprep.subr.msk.bf16.mxu0 %vm319_vm0, %v642_v22 }
  0x4e   : > { %579 = vmatpush3.bf16.xpose.msra.mxu0 %v345_v23 }
  0x4f   : > { %593 = vmatprep.subr.msk.bf16.mxu0 %vm319_vm0, %v643_v24 }
  0x56   : > { %581 = vmatpush3.bf16.xpose.msra.mxu0 %v348_v25 }
  0x5d   : > { %583 = vmatmul.mubr.msk.bf16.vlgmr.msra.gmra.mrb[0].mxu0 %vm319_vm0, %v645_v26 }
  0x91   : > { %v262_v27 = vpop.permute.xlu0 %261 }
  0x92   : > { %v252_v37 = vpop.permute.xlu1 %251 }
  0x95   : > { %v267_v31 = vpop.permute.xlu0 %266 }
  0x96   : > { %v257_v38 = vpop.permute.xlu1 %256 }
  0x99   : > { %v420_v51 = vpop.permute.xlu0 %419 }
  0x9a   : > { %v425_v52 = vpop.permute.xlu1 %424 }
  0x9d   : > { %v440_v63 = vpop.permute.xlu0 %439 }
  0x9e   : > { %v445_v2 = vrot.slane %v440_v63, %v444_v61 }
 0x130   : > { %v584_v28 = vpop.f32.mrb[0].mxu0 }
 0x131   : > { %v393_v29 = vadd.f32 %v584_v28, %v262_v27  ;;  %v384_v30 = vpop.f32.mrb[1].mxu0 }
 0x132   : > { %v585_v32 = vpop.f32.mrb[2].mxu0  ;;  %v385_v39 = vadd.f32 %v384_v30, %v252_v37 }
 0x133   : > { %v550_v33 = vmul.f32 -1.442695, %v393_v29  ;;  %v396_v34 = vadd.f32 %v585_v32, %v267_v31  ;;  %v387_v35 = vpop.f32.mrb[3].mxu0 }
 0x134   : > { %v388_v41 = vadd.f32 %v387_v35, %v257_v38 }
 0x135   : > { %646 = vpow2.f32 %v550_v33  ;;  %v551_v36 = vmul.f32 -1.442695, %v396_v34 }
 0x137   : > { %648 = vpow2.f32 %v551_v36 }
 0x138   : > { %650 = vtanh.f32 %v385_v39 }
 0x13f   : > { %v647_v40 = vpop.eup %646 }
 0x140   : > { %v407_v42 = vadd.f32 1.0, %v647_v40 }
 0x141   : > { %v649_v43 = vpop.eup %648 }
 0x142   : > { %652 = vrcp.f32 %v407_v42  ;;  %v408_v44 = vadd.f32 1.0, %v649_v43  ;;  %v651_v45 = vpop.eup %650 }
 0x143   : > { %654 = vtanh.f32 %v388_v41 }
 0x144   : > { %656 = vrcp.f32 %v408_v44 }
 0x14c   : > { %v653_v46 = vpop.eup %652 }
 0x14d   : > { %v655_v47 = vpop.eup %654  ;;  %v413_v48 = vmul.f32 %v653_v46, %v651_v45 }
 0x14e   : > { %v657_v49 = vpop.eup %656 }
 0x14f   : > { %v414_v50 = vmul.f32 %v657_v49, %v655_v47  ;;  %v427_v53 = vmul.f32 %v420_v51, %v413_v48 }
 0x151   : > { %v428_v54 = vmul.f32 %v425_v52, %v414_v50 }
 0x153   : > { %v429_v56 = vadd.f32 %v428_v54, %v427_v53 }
 0x155   : > { %v430_v57 = vrot.slane %v429_v56, 4 }
 0x157   : > { %v431_v59 = vadd.f32 %v430_v57, %v429_v56 }
 0x159   : > { %v432_v60 = vrot.slane %v431_v59, 2 }
 0x15b   : > { %v433_v62 = vadd.f32 %v432_v60, %v431_v59 }
 0x15d   : > { %v434_v1 = vrot.slane %v433_v62, 1 }
 0x15f   : > { %v435_v3 = vadd.f32 %v434_v1, %v433_v62 }
 0x161   : > { %v446_v4 = vadd.f32 %v445_v2, %v435_v3 }
 0x163   : > { %v450_v5 = vsel %vm449_vm1, %v446_v4, -inf }
 0x164   : > { %451 = vmax.xlane.f32.xlu1 %v450_v5 }
 0x1f1   : > { %v452_v6 = vpop.xlane.xlu1 %451 }
 0x1f2   : > { %v453_v7 = vsub.f32 %v450_v5, %v452_v6 }
 0x1f4   : > { %v454_v8 = vmul.f32 1.442695, %v453_v7 }
 0x1f6   : > { %658 = vpow2.f32 %v454_v8 }
 0x200   : > { %v659_v9 = vpop.eup %658 }
 0x201   : > { %456 = vadd.xlane.f32.xlu0 %v659_v9 }
 0x28e   : > { %v457_v10 = vpop.xlane.xlu0 %456 }
 0x28f   : > { %660 = vrcp.f32 %v457_v10 }
 0x299   : > { %v661_v11 = vpop.eup %660 }
 0x29a   : > { %v459_v12 = vmul.f32 %v661_v11, %v457_v10 }
 0x29c   : > { %v460_v13 = vsub.f32 2.0, %v459_v12 }
 0x29e   : > { %v461_v14 = vmul.f32 %v661_v11, %v460_v13 }
 0x2a0   : > { %v462_v15 = vmul.f32 %v659_v9, %v461_v14 }
 0x2a2   : > { %463 = vst [vmem:[%s218_s12] sm:$0x1] %v462_v15 }
 0x2a3   : > { %675 = shalt.err (!%p672_p3)
}
 0x2a4   : > { %s676_s26 = scalar_lea.hbm %s871_s16, 16  ;;  %s680_s7 = scalar_lea.hbm %s918_s5, 32 }
 0x2a5   : > { %p677_p4 = scmp.ne.s32.totalorder %s871_s16, %s676_s26  ;;  %p681_p9 = scmp.lt.u32.totalorder %s871_s16, %s918_s5 }
 0x2a6   : > { %p682_p10 = scmp.lt.u32.totalorder %s680_s7, %s676_s26  ;;  %p684_p12 = scmp.lt.u32.totalorder %s676_s26, %s871_s16 }
 0x2a7   : > { %p678_p7 = pnand %p677_p4, %p799_p5 }
 0x2a8   : > { %p683_p11 = por %p682_p10, %p681_p9 }
 0x2a9   : > { %p679_p8 = pneg %p678_p7 }
 0x2aa   : > { %p685_p13 = por %p684_p12, %p683_p11 }
 0x2ac   : > { %p686_p0 = pnand %p685_p13, %p679_p8 }
 0x2ae   : > { %689 = shalt.err (!%p686_p0)
}
 0x2af   : > { %594 = dma.vmem_to_hbm [thread:$0]  (%p799_p5), %s873_s13, 16, %s871_s16, %s465_s17  }
 0x2b0 PF: > { %p600_p1 = scmp.ge.s32.totalorder %s724_s23, 2  ;;  %s489_s10 = sand.u32 1, %s712_s20  }
 0x2b1   : > { %s490_s11 = scalar_lea.sflag [#allocation4], %s489_s10 }
 0x2b2   : > { %p597_p2 = pnand %p600_p1, %p803_p6 }
 0x2b4   : > { %707 = dma.done.wait (!%p597_p2), %s490_s11, 16  }
 0x2b5   : > { %709 = vsyncadd (!%p597_p2), %s490_s11, 4294967280  ;;  %p17_p3 = scmp.ge.s32.totalorder %s786_s25, 4   ;;  %s921_s20 = smov %s716_s21 }
 0x2b6   : > { %s922_s21 = smov %s720_s22  ;;  %s923_s22 = smov %s797_s28 }
 0x2b7   : > { %s924_s23 = smov %s786_s25  ;;  %19 = sbr.rel (!%p17_p3) target bundleno = 6 (0x6), region = 75 }
 0x2be   :  { %494 = vsyncpa [#allocation4], 1 }
 0x2bf   :  { %496 = vsyncpa [#allocation4 + $0x1], 1 }

</bundles_post_ra>
